<compile_context>
chip_gen: v7x
topology: tpu7x:2x2x1
jax: 0.10.0
libtpu: 0.0.40
codegen_flags: <defaults>
</compile_context>

<pallas_src>
import functools

import jax
import jax.numpy as jnp
from jax.experimental import pallas as pl
from jax.experimental.pallas import tpu as pltpu

LANE = 128
SUBLANE = 8


def _round_up(n, m):
    return ((n + m - 1) // m) * m


# ------------------------------- kernel ------------------------------------ #

def actor_deep_kernel(
    x_ref,
    w1_ref, b1_ref, w2_ref, b2_ref, w3_ref, b3_ref, w4_ref, b4_ref,
    out_ref,
    *, max_action,
):
    """Fused MLP forward: relu(l1) -> relu(l2) -> relu(l3) -> max_action*tanh(l4)."""

    def linear(h, w_ref, b_ref):
        # bf16 MXU matmul with f32 accumulation; bias add in f32.
        # x_ref is already bf16 (cast in the wrapper), so the layer-1 astype is a no-op;
        # later layers cast the f32 activations back to the weight dtype.
        return jnp.dot(h.astype(w_ref.dtype), w_ref[...],
                       preferred_element_type=jnp.float32) + b_ref[...]

    h = jnp.maximum(linear(x_ref[...], w1_ref, b1_ref), 0.0)
    h = jnp.maximum(linear(h, w2_ref, b2_ref), 0.0)
    h = jnp.maximum(linear(h, w3_ref, b3_ref), 0.0)
    out_ref[...] = (max_action * jnp.tanh(linear(h, w4_ref, b4_ref))).astype(out_ref.dtype)


# ----------------------------- parameters ---------------------------------- #

def init_linear(key, in_dim, out_dim):
    """PyTorch nn.Linear default init (uniform +-1/sqrt(fan_in)); weight stored (in, out)."""
    kw, kb = jax.random.split(key)
    bound = 1.0 / jnp.sqrt(jnp.float32(in_dim))
    w = jax.random.uniform(kw, (in_dim, out_dim), jnp.float32, -bound, bound)
    b = jax.random.uniform(kb, (out_dim,), jnp.float32, -bound, bound)
    return w, b


def make_actor_params(key, state_dim, action_dim, hidden=300):
    k1, k2, k3, k4 = jax.random.split(key, 4)
    return {
        "l1": init_linear(k1, state_dim, hidden),
        "l2": init_linear(k2, hidden, hidden),
        "l3": init_linear(k3, hidden, hidden),
        "l4": init_linear(k4, hidden, action_dim),
    }


def _pad2(a, rows, cols):
    return jnp.pad(a, ((0, rows - a.shape[0]), (0, cols - a.shape[1])))


def prepare_padded_params(params, compute_dtype=jnp.bfloat16):
    """Zero-pad weights/biases to lane-aligned shapes and cast weights to bf16.

    Call this ONCE (e.g. via make_actor_deep_forward) and reuse the result; it
    is deliberately kept out of the per-call forward path.
    """
    s, h = params["l1"][0].shape
    a = params["l4"][0].shape[1]
    sp, hp, ap = _round_up(s, LANE), _round_up(h, LANE), _round_up(a, LANE)

    def pw(w, rows, cols):
        return _pad2(w, rows, cols).astype(compute_dtype)

    def pb(b, cols):
        return jnp.pad(b, (0, cols - b.shape[0])).reshape(1, cols).astype(jnp.float32)

    flat = (
        pw(params["l1"][0], sp, hp), pb(params["l1"][1], hp),
        pw(params["l2"][0], hp, hp), pb(params["l2"][1], hp),
        pw(params["l3"][0], hp, hp), pb(params["l3"][1], hp),
        pw(params["l4"][0], hp, ap), pb(params["l4"][1], ap),
    )
    # Materialize padded/cast weights on device now so later calls just DMA them.
    flat = tuple(jnp.asarray(t) for t in jax.device_put(flat))
    return flat, (sp, hp, ap)


# ------------------------------ forward ------------------------------------ #

def _pick_batch_tile(batch):
    """Batch tile selection per review: cap 512, but keep >=2 grid steps for
    batches > 256 so both v7x TensorCores get work under 'parallel' semantics.
    (One extra ~0.35us step on single-TC chips -- negligible.)"""
    tb = min(_round_up(batch, SUBLANE), 512)
    bp = _round_up(batch, tb)
    if bp // tb < 2 and batch > 256:
        tb = _round_up((bp + 1) // 2, SUBLANE)
        bp = _round_up(batch, tb)
    return tb, bp


def actor_deep_forward_padded(flat, dims, x, action_dim, max_action,
                              compute_dtype=jnp.bfloat16):
    """Forward pass given already-padded/cast parameters (see prepare_padded_params)."""
    sp, hp, ap = dims
    B, s = x.shape

    tb, bp = _pick_batch_tile(B)
    # Pad AND cast x to bf16 in the wrapper: halves the x-tile HBM->VMEM DMA;
    # the kernel would have rounded it to bf16 anyway, so numerics are identical.
    x_p = jnp.pad(x, ((0, bp - B), (0, sp - s))).astype(compute_dtype)

    const = lambda i: (0, 0)  # weights/biases: same block every grid step (no re-fetch)
    in_specs = [
        pl.BlockSpec((tb, sp), lambda i: (i, 0)),                     # x tile
        pl.BlockSpec((sp, hp), const), pl.BlockSpec((1, hp), const),  # l1
        pl.BlockSpec((hp, hp), const), pl.BlockSpec((1, hp), const),  # l2
        pl.BlockSpec((hp, hp), const), pl.BlockSpec((1, hp), const),  # l3
        pl.BlockSpec((hp, ap), const), pl.BlockSpec((1, ap), const),  # l4
    ]
    out_spec = pl.BlockSpec((tb, ap), lambda i: (i, 0))               # lane-dense (128-wide)

    kernel = functools.partial(actor_deep_kernel, max_action=float(max_action))
    out_p = pl.pallas_call(
        kernel,
        out_shape=jax.ShapeDtypeStruct((bp, ap), jnp.float32),
        grid=(bp // tb,),
        in_specs=in_specs,
        out_specs=out_spec,
        compiler_params=pltpu.CompilerParams(dimension_semantics=("parallel",)),
    )(x_p, *flat)

    return out_p[:B, :action_dim]


def make_actor_deep_forward(params, max_action, compute_dtype=jnp.bfloat16):
    """Pad/cast the weights ONCE and return a jitted forward(x) closure."""
    flat, dims = prepare_padded_params(params, compute_dtype)
    action_dim = params["l4"][0].shape[1]

    @jax.jit
    def forward(x):
        return actor_deep_forward_padded(flat, dims, x, action_dim, max_action,
                                         compute_dtype)

    return forward


# Convenience one-shot API (pads every call; prefer make_actor_deep_forward for reuse).
def actor_deep_forward(params, x, max_action, compute_dtype=jnp.bfloat16):
    flat, dims = prepare_padded_params(params, compute_dtype)
    return actor_deep_forward_padded(flat, dims, x, params["l4"][0].shape[1],
                                     max_action, compute_dtype)


# ----------------------------- references ---------------------------------- #

def _reference_forward_f32(params, x, max_action):
    h = jax.nn.relu(x @ params["l1"][0] + params["l1"][1])
    h = jax.nn.relu(h @ params["l2"][0] + params["l2"][1])
    h = jax.nn.relu(h @ params["l3"][0] + params["l3"][1])
    return max_action * jnp.tanh(h @ params["l4"][0] + params["l4"][1])


def _reference_forward_bf16(params, x, max_action):
    """Mirrors the kernel numerics: bf16 matmul inputs, f32 accumulation."""
    def lin(h, p):
        return jnp.dot(h.astype(jnp.bfloat16), p[0].astype(jnp.bfloat16),
                       preferred_element_type=jnp.float32) + p[1]
    h = jax.nn.relu(lin(x, params["l1"]))
    h = jax.nn.relu(lin(h, params["l2"]))
    h = jax.nn.relu(lin(h, params["l3"]))
    return max_action * jnp.tanh(lin(h, params["l4"]))


if __name__ == "__main__":
    state_dim, action_dim, max_action = 12, 4, 2.0
    batch = 8

    root = jax.random.PRNGKey(0)
    k_params, k_x = jax.random.split(root)

    params = make_actor_params(k_params, state_dim, action_dim)
    x = jax.random.normal(k_x, (batch, state_dim), jnp.float32)

    # Weights are padded / cast to bf16 exactly once, outside the call path.
    forward = make_actor_deep_forward(params, max_action)

    out = forward(x)
    jax.block_until_ready(out)

    assert out.shape == (batch, action_dim)
    assert bool(jnp.all(jnp.abs(out) <= max_action + 1e-5))

    # Kernel-exactness check against a bf16-matmul reference (same rounding as kernel).
    ref_bf16 = _reference_forward_bf16(params, x, max_action)
    assert jnp.allclose(out, ref_bf16, atol=1e-3, rtol=1e-3)

    # Semantic check against the full-f32 PyTorch-equivalent forward
    # (looser tolerance because the kernel uses bf16 matmul inputs).
    ref_f32 = _reference_forward_f32(params, x, max_action)
    assert jnp.allclose(out, ref_f32, atol=5e-2, rtol=5e-2)

    # Second call reuses the cached padded weights (no re-pad/re-cast).
    out2 = forward(x)
    jax.block_until_ready(out2)
    assert jnp.allclose(out, out2)

    print("KERNEL_OK")
</pallas_src>

<mosaic_0001>
module attributes {stable_mosaic.version = 11 : i64} {
  func.func @actor_deep_kernel(%arg0: i32, %arg1: memref<8x128xbf16, #tpu.memory_space<vmem>>, %arg2: memref<128x384xbf16, #tpu.memory_space<vmem>>, %arg3: memref<1x384xf32, #tpu.memory_space<vmem>>, %arg4: memref<384x384xbf16, #tpu.memory_space<vmem>>, %arg5: memref<1x384xf32, #tpu.memory_space<vmem>>, %arg6: memref<384x384xbf16, #tpu.memory_space<vmem>>, %arg7: memref<1x384xf32, #tpu.memory_space<vmem>>, %arg8: memref<384x128xbf16, #tpu.memory_space<vmem>>, %arg9: memref<1x128xf32, #tpu.memory_space<vmem>>, %arg10: memref<8x128xf32, #tpu.memory_space<vmem>>) attributes {dimension_semantics = [#tpu.dimension_semantics<parallel>], iteration_bounds = array<i64: 1>, scalar_prefetch = 0 : i64, scratch_operands = 0 : i64, tpu.core_type = #tpu.core_type<tc>, window_params = [{transform_indices = @transform_0, window_bounds = array<i64: 8, 128>}, {pipeline_mode = #tpu.pipeline_mode<synchronous>, transform_indices = @transform_1, window_bounds = array<i64: 128, 384>}, {pipeline_mode = #tpu.pipeline_mode<synchronous>, transform_indices = @transform_2, window_bounds = array<i64: 1, 384>}, {pipeline_mode = #tpu.pipeline_mode<synchronous>, transform_indices = @transform_3, window_bounds = array<i64: 384, 384>}, {pipeline_mode = #tpu.pipeline_mode<synchronous>, transform_indices = @transform_4, window_bounds = array<i64: 1, 384>}, {pipeline_mode = #tpu.pipeline_mode<synchronous>, transform_indices = @transform_5, window_bounds = array<i64: 384, 384>}, {pipeline_mode = #tpu.pipeline_mode<synchronous>, transform_indices = @transform_6, window_bounds = array<i64: 1, 384>}, {pipeline_mode = #tpu.pipeline_mode<synchronous>, transform_indices = @transform_7, window_bounds = array<i64: 384, 128>}, {pipeline_mode = #tpu.pipeline_mode<synchronous>, transform_indices = @transform_8, window_bounds = array<i64: 1, 128>}, {transform_indices = @transform_9, window_bounds = array<i64: 8, 128>}]} {
    %c0 = arith.constant 0 : index
    %c0_0 = arith.constant 0 : index
    %0 = vector.load %arg1[%c0, %c0_0] : memref<8x128xbf16, #tpu.memory_space<vmem>>, vector<8x128xbf16>
    %c0_1 = arith.constant 0 : index
    %c0_2 = arith.constant 0 : index
    %1 = vector.load %arg2[%c0_1, %c0_2] : memref<128x384xbf16, #tpu.memory_space<vmem>>, vector<128x384xbf16>
    %cst = arith.constant dense<0.000000e+00> : vector<8x384xf32>
    %2 = tpu.matmul %0, %1, %cst {dimension_numbers = #tpu.dot_dimension_numbers<[1], [0], [0], [1], [0, 0, 1, 1], [], []>} : vector<8x128xbf16>, vector<128x384xbf16>, vector<8x384xf32> -> vector<8x384xf32>
    %c0_3 = arith.constant 0 : index
    %c0_4 = arith.constant 0 : index
    %3 = vector.load %arg3[%c0_3, %c0_4] : memref<1x384xf32, #tpu.memory_space<vmem>>, vector<1x384xf32>
    %4 = vector.broadcast %3 : vector<1x384xf32> to vector<8x384xf32>
    %5 = arith.addf %2, %4 : vector<8x384xf32>
    %cst_5 = arith.constant 0.000000e+00 : f32
    %6 = vector.broadcast %cst_5 : f32 to vector<8x384xf32>
    %7 = arith.maximumf %5, %6 : vector<8x384xf32>
    %8 = arith.truncf %7 : vector<8x384xf32> to vector<8x384xbf16>
    %c0_6 = arith.constant 0 : index
    %c0_7 = arith.constant 0 : index
    %9 = vector.load %arg4[%c0_6, %c0_7] : memref<384x384xbf16, #tpu.memory_space<vmem>>, vector<384x384xbf16>
    %cst_8 = arith.constant dense<0.000000e+00> : vector<8x384xf32>
    %10 = tpu.matmul %8, %9, %cst_8 {dimension_numbers = #tpu.dot_dimension_numbers<[1], [0], [0], [1], [0, 0, 1, 1], [], []>} : vector<8x384xbf16>, vector<384x384xbf16>, vector<8x384xf32> -> vector<8x384xf32>
    %c0_9 = arith.constant 0 : index
    %c0_10 = arith.constant 0 : index
    %11 = vector.load %arg5[%c0_9, %c0_10] : memref<1x384xf32, #tpu.memory_space<vmem>>, vector<1x384xf32>
    %12 = vector.broadcast %11 : vector<1x384xf32> to vector<8x384xf32>
    %13 = arith.addf %10, %12 : vector<8x384xf32>
    %cst_11 = arith.constant 0.000000e+00 : f32
    %14 = vector.broadcast %cst_11 : f32 to vector<8x384xf32>
    %15 = arith.maximumf %13, %14 : vector<8x384xf32>
    %16 = arith.truncf %15 : vector<8x384xf32> to vector<8x384xbf16>
    %c0_12 = arith.constant 0 : index
    %c0_13 = arith.constant 0 : index
    %17 = vector.load %arg6[%c0_12, %c0_13] : memref<384x384xbf16, #tpu.memory_space<vmem>>, vector<384x384xbf16>
    %cst_14 = arith.constant dense<0.000000e+00> : vector<8x384xf32>
    %18 = tpu.matmul %16, %17, %cst_14 {dimension_numbers = #tpu.dot_dimension_numbers<[1], [0], [0], [1], [0, 0, 1, 1], [], []>} : vector<8x384xbf16>, vector<384x384xbf16>, vector<8x384xf32> -> vector<8x384xf32>
    %c0_15 = arith.constant 0 : index
    %c0_16 = arith.constant 0 : index
    %19 = vector.load %arg7[%c0_15, %c0_16] : memref<1x384xf32, #tpu.memory_space<vmem>>, vector<1x384xf32>
    %20 = vector.broadcast %19 : vector<1x384xf32> to vector<8x384xf32>
    %21 = arith.addf %18, %20 : vector<8x384xf32>
    %cst_17 = arith.constant 0.000000e+00 : f32
    %22 = vector.broadcast %cst_17 : f32 to vector<8x384xf32>
    %23 = arith.maximumf %21, %22 : vector<8x384xf32>
    %24 = arith.truncf %23 : vector<8x384xf32> to vector<8x384xbf16>
    %c0_18 = arith.constant 0 : index
    %c0_19 = arith.constant 0 : index
    %25 = vector.load %arg8[%c0_18, %c0_19] : memref<384x128xbf16, #tpu.memory_space<vmem>>, vector<384x128xbf16>
    %cst_20 = arith.constant dense<0.000000e+00> : vector<8x128xf32>
    %26 = tpu.matmul %24, %25, %cst_20 {dimension_numbers = #tpu.dot_dimension_numbers<[1], [0], [0], [1], [0, 0, 1, 1], [], []>} : vector<8x384xbf16>, vector<384x128xbf16>, vector<8x128xf32> -> vector<8x128xf32>
    %c0_21 = arith.constant 0 : index
    %c0_22 = arith.constant 0 : index
    %27 = vector.load %arg9[%c0_21, %c0_22] : memref<1x128xf32, #tpu.memory_space<vmem>>, vector<1x128xf32>
    %28 = vector.broadcast %27 : vector<1x128xf32> to vector<8x128xf32>
    %29 = arith.addf %26, %28 : vector<8x128xf32>
    %30 = math.tanh %29 : vector<8x128xf32>
    %cst_23 = arith.constant 2.000000e+00 : f32
    %31 = vector.broadcast %cst_23 : f32 to vector<8x128xf32>
    %32 = arith.mulf %31, %30 : vector<8x128xf32>
    %c0_24 = arith.constant 0 : index
    %c0_25 = arith.constant 0 : index
    %33 = vector.load %arg10[%c0_24, %c0_25] : memref<8x128xf32, #tpu.memory_space<vmem>>, vector<8x128xf32>
    tpu.vector_store %arg10[%c0_24, %c0_25], %32 {strides = array<i32>} : memref<8x128xf32, #tpu.memory_space<vmem>>, vector<8x128xf32>,
    return
  }
  func.func @transform_0(%arg0: i32) -> (i32, i32) {
    %c0_i32 = arith.constant 0 : i32
    %c0_i32_0 = arith.constant 0 : i32
    return %arg0, %c0_i32 : i32, i32
  }
  func.func @transform_1(%arg0: i32) -> (i32, i32) {
    %c0_i32 = arith.constant 0 : i32
    %c0_i32_0 = arith.constant 0 : i32
    %c0_i32_1 = arith.constant 0 : i32
    return %c0_i32, %c0_i32_0 : i32, i32
  }
  func.func @transform_2(%arg0: i32) -> (i32, i32) {
    %c0_i32 = arith.constant 0 : i32
    %c0_i32_0 = arith.constant 0 : i32
    %c0_i32_1 = arith.constant 0 : i32
    return %c0_i32, %c0_i32_0 : i32, i32
  }
  func.func @transform_3(%arg0: i32) -> (i32, i32) {
    %c0_i32 = arith.constant 0 : i32
    %c0_i32_0 = arith.constant 0 : i32
    %c0_i32_1 = arith.constant 0 : i32
    return %c0_i32, %c0_i32_0 : i32, i32
  }
  func.func @transform_4(%arg0: i32) -> (i32, i32) {
    %c0_i32 = arith.constant 0 : i32
    %c0_i32_0 = arith.constant 0 : i32
    %c0_i32_1 = arith.constant 0 : i32
    return %c0_i32, %c0_i32_0 : i32, i32
  }
  func.func @transform_5(%arg0: i32) -> (i32, i32) {
    %c0_i32 = arith.constant 0 : i32
    %c0_i32_0 = arith.constant 0 : i32
    %c0_i32_1 = arith.constant 0 : i32
    return %c0_i32, %c0_i32_0 : i32, i32
  }
  func.func @transform_6(%arg0: i32) -> (i32, i32) {
    %c0_i32 = arith.constant 0 : i32
    %c0_i32_0 = arith.constant 0 : i32
    %c0_i32_1 = arith.constant 0 : i32
    return %c0_i32, %c0_i32_0 : i32, i32
  }
  func.func @transform_7(%arg0: i32) -> (i32, i32) {
    %c0_i32 = arith.constant 0 : i32
    %c0_i32_0 = arith.constant 0 : i32
    %c0_i32_1 = arith.constant 0 : i32
    return %c0_i32, %c0_i32_0 : i32, i32
  }
  func.func @transform_8(%arg0: i32) -> (i32, i32) {
    %c0_i32 = arith.constant 0 : i32
    %c0_i32_0 = arith.constant 0 : i32
    %c0_i32_1 = arith.constant 0 : i32
    return %c0_i32, %c0_i32_0 : i32, i32
  }
  func.func @transform_9(%arg0: i32) -> (i32, i32) {
    %c0_i32 = arith.constant 0 : i32
    %c0_i32_0 = arith.constant 0 : i32
    return %arg0, %c0_i32 : i32, i32
  }
}

</mosaic_0001>

<bundles_post_ra>
// kernel: forward.1
= control target key start
LH: loop header
LB: loop body
LE: loop exit
PB: predicated region body
PF: predicated region fallthrough
CT: control target
= control target key end

     0   :  { %v2554_v1 = vmov 0.0   ;;  %v2555_v2 = vmov 0   ;;  %vm2556_vm0 = vmmov 0   ;;  %s3267_s1 = inlined_call_operand.vmem [shape: bf16[128,384], index: 1, kind: input, shape index: {}]   ;;  %s3268_s3 = inlined_call_operand.vmem [shape: bf16[384,384], index: 3, kind: input, shape index: {}]   ;;  %s3269_s0 = inlined_call_operand.vmem [shape: bf16[8,128], index: 0, kind: input, shape index: {}]   ;;  %s3270_s5 = inlined_call_operand.vmem [shape: bf16[384,384], index: 5, kind: input, shape index: {}]   ;;  %s3271_s2 = inlined_call_operand.vmem [shape: f32[1,384], index: 2, kind: input, shape index: {}]   ;;  %s3272_s4 = inlined_call_operand.vmem [shape: f32[1,384], index: 4, kind: input, shape index: {}]   ;;  %s3273_s7 = inlined_call_operand.vmem [shape: bf16[384,128], index: 7, kind: input, shape index: {}]   ;;  %s3274_s6 = inlined_call_operand.vmem [shape: f32[1,384], index: 6, kind: input, shape index: {}]   ;;  %s3275_s8 = inlined_call_operand.vmem [shape: f32[1,128], index: 8, kind: input, shape index: {}]   ;;  %s3276_s9 = inlined_call_operand.vmem [shape: f32[8,128], index: 9, kind: output, shape index: {}]  }
   0x1   :  { %v2304_v0 = vld [vmem:[%s3267_s1 + $0x4] ss:$12 sps:$4 sm:$0xff]   ;;  %2209 = vmatprep.subr.bf16.mxu1 %v2554_v1  ;;  %243 = vmatprep.mubr.bf16.mxu0 %v2555_v2  ;;  %v2306_v3 = vld [vmem:[%s3267_s1] ss:$12 sps:$4 sm:$0xff]   ;;  %v2307_v4 = vld [vmem:[%s3267_s1 + $0x1c] ss:$12 sps:$4 sm:$0xff]  }
   0x2   :  { %2225 = vmatprep.mubr.msk.bf16.mxu1 %vm2556_vm0, %v2554_v1  ;;  %211 = vmatprep.subr.bf16.mxu0 %v2304_v0  ;;  %v2309_v5 = vld [vmem:[%s3267_s1 + $0x18] ss:$12 sps:$4 sm:$0xff]   ;;  %v2310_v6 = vld [vmem:[%s3267_s1 + $0x34] ss:$12 sps:$4 sm:$0xff]   ;;  %v2312_v7 = vld [vmem:[%s3267_s1 + $0x30] ss:$12 sps:$4 sm:$0xff]  }
   0x3   :  { %212 = vmatpush1.bf16.msra.mxu0 %v2306_v3  ;;  %v2313_v8 = vld [vmem:[%s3267_s1 + $0x4c] ss:$12 sps:$4 sm:$0xff]   ;;  %v2315_v9 = vld [vmem:[%s3267_s1 + $0x48] ss:$12 sps:$4 sm:$0xff]   ;;  %v2316_v11 = vld [vmem:[%s3267_s1 + $0x64] ss:$12 sps:$4 sm:$0xff]  }
   0x4   :  { %213 = vmatprep.subr.bf16.mxu0 %v2307_v4  ;;  %v2328_v10 = vld [vmem:[%s3267_s1 + $0x8] ss:$12 sps:$4 sm:$0xff]   ;;  %v2329_v12 = vld [vmem:[%s3267_s1 + $0x20] ss:$12 sps:$4 sm:$0xff]   ;;  %v2330_v15 = vld [vmem:[%s3267_s1 + $0x38] ss:$12 sps:$4 sm:$0xff]  }
   0x5   :  { %2210 = vmatpush3.bf16.msra.mxu1 %v2328_v10  ;;  %v2318_v13 = vld [vmem:[%s3267_s1 + $0x60] ss:$12 sps:$4 sm:$0xff]   ;;  %v2319_v14 = vld [vmem:[%s3267_s1 + $0x7c] ss:$12 sps:$4 sm:$0xff]   ;;  %v2321_v16 = vld [vmem:[%s3267_s1 + $0x78] ss:$12 sps:$4 sm:$0xff]  }
   0x6   :  { %2211 = vmatprep.subr.bf16.mxu1 %v2554_v1  ;;  %v2322_v17 = vld [vmem:[%s3267_s1 + $0x94] ss:$12 sps:$4 sm:$0xff]   ;;  %v2331_v18 = vld [vmem:[%s3267_s1 + $0x50] ss:$12 sps:$4 sm:$0xff]   ;;  %v2325_v20 = vld [vmem:[%s3267_s1 + $0xac] ss:$12 sps:$4 sm:$0xff]  }
   0x7   :  { %214 = vmatpush1.bf16.msra.mxu0 %v2309_v5  ;;  %v2324_v19 = vld [vmem:[%s3267_s1 + $0x90] ss:$12 sps:$4 sm:$0xff]   ;;  %v2332_v21 = vld [vmem:[%s3267_s1 + $0x68] ss:$12 sps:$4 sm:$0xff]   ;;  %v2333_v24 = vld [vmem:[%s3267_s1 + $0x80] ss:$12 sps:$4 sm:$0xff]  }
   0x8   :  { %215 = vmatprep.subr.bf16.mxu0 %v2310_v6  ;;  %v2327_v22 = vld [vmem:[%s3267_s1 + $0xa8] ss:$12 sps:$4 sm:$0xff]   ;;  %v2338_v23 = vld [vmem:[%s3268_s3 + $0x4] ss:$12 sps:$4 sm:$0xff]   ;;  %v33_v25 = vld [vmem:[%s3269_s0] sm:$0xf] }
   0x9   :  { %2212 = vmatpush3.bf16.msra.mxu1 %v2329_v12  ;;  %v2336_v26 = vld [vmem:[%s3268_s3] ss:$12 sps:$4 sm:$0xff]   ;;  %v2341_v27 = vld [vmem:[%s3268_s3 + $0x1c] ss:$12 sps:$4 sm:$0xff]   ;;  %v2334_v28 = vld [vmem:[%s3267_s1 + $0x98] ss:$12 sps:$4 sm:$0xff]  }
   0xa   :  { %2213 = vmatprep.subr.bf16.mxu1 %v2554_v1  ;;  %v2339_v29 = vld [vmem:[%s3268_s3 + $0x18] ss:$12 sps:$4 sm:$0xff]   ;;  %v2344_v30 = vld [vmem:[%s3268_s3 + $0x34] ss:$12 sps:$4 sm:$0xff]   ;;  %v2335_v31 = vld [vmem:[%s3267_s1 + $0xb0] ss:$12 sps:$4 sm:$0xff]  }
   0xb   :  { %216 = vmatpush1.bf16.msra.mxu0 %v2312_v7  ;;  %v2363_v32 = vld [vmem:[%s3268_s3 + $0xc8] ss:$12 sps:$4 sm:$0xff]   ;;  %v2342_v33 = vld [vmem:[%s3268_s3 + $0x30] ss:$12 sps:$4 sm:$0xff]   ;;  %v2347_v34 = vld [vmem:[%s3268_s3 + $0x4c] ss:$12 sps:$4 sm:$0xff]  }
   0xc   :  { %217 = vmatprep.subr.bf16.mxu0 %v2313_v8  ;;  %v2364_v35 = vld [vmem:[%s3268_s3 + $0x8] ss:$12 sps:$4 sm:$0xff]   ;;  %v2368_v36 = vld [vmem:[%s3268_s3 + $0xe0] ss:$12 sps:$4 sm:$0xff]   ;;  %v2350_v38 = vld [vmem:[%s3268_s3 + $0x64] ss:$12 sps:$4 sm:$0xff]  }
   0xd   :  { %2214 = vmatpush3.bf16.msra.mxu1 %v2330_v15  ;;  %v2345_v37 = vld [vmem:[%s3268_s3 + $0x48] ss:$12 sps:$4 sm:$0xff]   ;;  %v2369_v39 = vld [vmem:[%s3268_s3 + $0x20] ss:$12 sps:$4 sm:$0xff]   ;;  %v2373_v40 = vld [vmem:[%s3268_s3 + $0xf8] ss:$12 sps:$4 sm:$0xff]  }
   0xe   :  { %2215 = vmatprep.subr.bf16.mxu1 %v2554_v1  ;;  %v2348_v41 = vld [vmem:[%s3268_s3 + $0x60] ss:$12 sps:$4 sm:$0xff]   ;;  %v2353_v42 = vld [vmem:[%s3268_s3 + $0x7c] ss:$12 sps:$4 sm:$0xff]   ;;  %v2351_v43 = vld [vmem:[%s3268_s3 + $0x78] ss:$12 sps:$4 sm:$0xff]  }
   0xf   :  { %218 = vmatpush1.bf16.msra.mxu0 %v2315_v9  ;;  %v2374_v44 = vld [vmem:[%s3268_s3 + $0x38] ss:$12 sps:$4 sm:$0xff]   ;;  %v2378_v45 = vld [vmem:[%s3268_s3 + $0x110] ss:$12 sps:$4 sm:$0xff]   ;;  %v2356_v46 = vld [vmem:[%s3268_s3 + $0x94] ss:$12 sps:$4 sm:$0xff]  }
  0x10   :  { %219 = vmatprep.subr.bf16.mxu0 %v2316_v11  ;;  %v2379_v47 = vld [vmem:[%s3268_s3 + $0x50] ss:$12 sps:$4 sm:$0xff]   ;;  %v2383_v48 = vld [vmem:[%s3268_s3 + $0x128] ss:$12 sps:$4 sm:$0xff]   ;;  %v2359_v50 = vld [vmem:[%s3268_s3 + $0xac] ss:$12 sps:$4 sm:$0xff]  }
  0x11   :  { %2216 = vmatpush3.bf16.msra.mxu1 %v2331_v18  ;;  %v2354_v49 = vld [vmem:[%s3268_s3 + $0x90] ss:$12 sps:$4 sm:$0xff]   ;;  %v2384_v51 = vld [vmem:[%s3268_s3 + $0x68] ss:$12 sps:$4 sm:$0xff]   ;;  %v2388_v52 = vld [vmem:[%s3268_s3 + $0x140] ss:$12 sps:$4 sm:$0xff]  }
  0x12   :  { %2217 = vmatprep.subr.bf16.mxu1 %v2554_v1  ;;  %v2357_v53 = vld [vmem:[%s3268_s3 + $0xa8] ss:$12 sps:$4 sm:$0xff]   ;;  %v2362_v54 = vld [vmem:[%s3268_s3 + $0xc4] ss:$12 sps:$4 sm:$0xff]   ;;  %v2389_v55 = vld [vmem:[%s3268_s3 + $0x80] ss:$12 sps:$4 sm:$0xff]  }
  0x13   :  { %220 = vmatpush1.bf16.msra.mxu0 %v2318_v13  ;;  %v2360_v56 = vld [vmem:[%s3268_s3 + $0xc0] ss:$12 sps:$4 sm:$0xff]   ;;  %v2367_v57 = vld [vmem:[%s3268_s3 + $0xdc] ss:$12 sps:$4 sm:$0xff]   ;;  %v2365_v58 = vld [vmem:[%s3268_s3 + $0xd8] ss:$12 sps:$4 sm:$0xff]  }
  0x14   :  { %221 = vmatprep.subr.bf16.mxu0 %v2319_v14  ;;  %v2372_v59 = vld [vmem:[%s3268_s3 + $0xf4] ss:$12 sps:$4 sm:$0xff]   ;;  %v2370_v60 = vld [vmem:[%s3268_s3 + $0xf0] ss:$12 sps:$4 sm:$0xff]   ;;  %v2377_v61 = vld [vmem:[%s3268_s3 + $0x10c] ss:$12 sps:$4 sm:$0xff]   ;;  %v68_v14 = vlaneseq }
  0x15   :  { %2218 = vmatpush3.bf16.msra.mxu1 %v2332_v21  ;;  %v2375_v62 = vld [vmem:[%s3268_s3 + $0x108] ss:$12 sps:$4 sm:$0xff]   ;;  %v2382_v63 = vld [vmem:[%s3268_s3 + $0x124] ss:$12 sps:$4 sm:$0xff]   ;;  %v2380_v0 = vld [vmem:[%s3268_s3 + $0x120] ss:$12 sps:$4 sm:$0xff]  }
  0x16   :  { %2219 = vmatprep.subr.bf16.mxu1 %v2554_v1  ;;  %v2387_v3 = vld [vmem:[%s3268_s3 + $0x13c] ss:$12 sps:$4 sm:$0xff]   ;;  %v2385_v4 = vld [vmem:[%s3268_s3 + $0x138] ss:$12 sps:$4 sm:$0xff]   ;;  %v2392_v5 = vld [vmem:[%s3268_s3 + $0x154] ss:$12 sps:$4 sm:$0xff]  }
  0x17   :  { %222 = vmatpush1.bf16.msra.mxu0 %v2321_v16  ;;  %v2393_v6 = vld [vmem:[%s3268_s3 + $0x158] ss:$12 sps:$4 sm:$0xff]   ;;  %v2390_v7 = vld [vmem:[%s3268_s3 + $0x150] ss:$12 sps:$4 sm:$0xff]   ;;  %v2395_v11 = vld [vmem:[%s3268_s3 + $0x168] ss:$12 sps:$4 sm:$0xff]  }
  0x18   :  { %223 = vmatprep.subr.bf16.mxu0 %v2322_v17  ;;  %v2394_v8 = vld [vmem:[%s3268_s3 + $0x98] ss:$12 sps:$4 sm:$0xff]   ;;  %v2398_v10 = vld [vmem:[%s3268_s3 + $0x170] ss:$12 sps:$4 sm:$0xff]   ;;  %v69_v15 = vshrl.u32 %v68_v14, 7 }
  0x19   :  { %2220 = vmatpush3.bf16.msra.mxu1 %v2333_v24  ;;  %v2397_v9 = vld [vmem:[%s3268_s3 + $0x16c] ss:$12 sps:$4 sm:$0xff]   ;;  %v2399_v12 = vld [vmem:[%s3268_s3 + $0xb0] ss:$12 sps:$4 sm:$0xff]   ;;  %v2846_v17 = vld [vmem:[%s3271_s2] sm:$0x7] }
  0x1a   :  { %2221 = vmatprep.subr.bf16.mxu1 %v2554_v1  ;;  %v2402_v13 = vld [vmem:[%s3268_s3 + $0x184] ss:$12 sps:$4 sm:$0xff]   ;;  %v2841_v16 = vsub.s32 0, %v69_v15  ;;  %v2848_v18 = vsub.s32 1, %v69_v15 }
  0x1b   :  { %224 = vmatpush1.bf16.msra.mxu0 %v2324_v19  ;;  %v2450_v14 = vld [vmem:[%s3270_s5 + $0x90] ss:$12 sps:$4 sm:$0xff]  }
  0x1c   :  { %225 = vmatprep.subr.bf16.mxu0 %v2325_v20  ;;  %v71_v19 = vrot.slane %v2846_v17, %v2841_v16  ;;  %v75_v20 = vrot.slane %v2846_v17, %v2848_v18 }
  0x1d   :  { %2222 = vmatpush3.bf16.msra.mxu1 %v2334_v28 }
  0x1e   :  { %2223 = vmatprep.subr.bf16.mxu1 %v2554_v1 }
  0x1f   :  { %226 = vmatpush1.bf16.msra.mxu0 %v2327_v22 }
  0x20   :  { %795 = vmatprep.subr.bf16.mxu0 %v2338_v23 }
  0x21   :  { %2224 = vmatpush3.bf16.msra.mxu1 %v2335_v31  ;;  %v2403_v31 = vld [vmem:[%s3268_s3 + $0x188] ss:$12 sps:$4 sm:$0xff]  }
  0x22   :  { %244 = vmatmul.mubr.bf16.vlgmr.msra.gmra.mrb[0].mxu0 %v33_v25  ;;  %2116 = vmatprep.subr.bf16.mxu1 %v2363_v32 }
  0x23   :  { %796 = vmatpush1.bf16.msra.mxu0 %v2336_v26 }
  0x24   :  { %797 = vmatprep.subr.bf16.mxu0 %v2341_v27  ;;  %2226 = vmatmul.mubr.bf16.vlgmr.msra.gmra.mrb[0].mxu1 %v33_v25 }
  0x25   :  { %2117 = vmatpush3.bf16.msra.mxu1 %v2364_v35  ;;  %v2407_v35 = vld [vmem:[%s3268_s3 + $0x1a0] ss:$12 sps:$4 sm:$0xff]  }
  0x26   :  { %2118 = vmatprep.subr.bf16.mxu1 %v2368_v36 }
  0x27   :  { %798 = vmatpush1.bf16.msra.mxu0 %v2339_v29 }
  0x28   :  { %799 = vmatprep.subr.bf16.mxu0 %v2344_v30  ;;  %v2400_v30 = vld [vmem:[%s3268_s3 + $0x180] ss:$12 sps:$4 sm:$0xff]  }
  0x29   :  { %2119 = vmatpush3.bf16.msra.mxu1 %v2369_v39 }
  0x2a   :  { %2120 = vmatprep.subr.bf16.mxu1 %v2373_v40 }
  0x2b   :  { %800 = vmatpush1.bf16.msra.mxu0 %v2342_v33  ;;  %v2406_v33 = vld [vmem:[%s3268_s3 + $0x19c] ss:$12 sps:$4 sm:$0xff]  }
  0x2c   :  { %801 = vmatprep.subr.bf16.mxu0 %v2347_v34  ;;  %v2404_v34 = vld [vmem:[%s3268_s3 + $0x198] ss:$12 sps:$4 sm:$0xff]  }
  0x2d   :  { %2121 = vmatpush3.bf16.msra.mxu1 %v2374_v44  ;;  %v2412_v44 = vld [vmem:[%s3268_s3 + $0x1c8] ss:$12 sps:$4 sm:$0xff]  }
  0x2e   :  { %2122 = vmatprep.subr.bf16.mxu1 %v2378_v45  ;;  %v2415_v45 = vld [vmem:[%s3268_s3 + $0x1d0] ss:$12 sps:$4 sm:$0xff]  }
  0x2f   :  { %802 = vmatpush1.bf16.msra.mxu0 %v2345_v37  ;;  %v2410_v37 = vld [vmem:[%s3268_s3 + $0x1b4] ss:$12 sps:$4 sm:$0xff]  }
  0x30   :  { %803 = vmatprep.subr.bf16.mxu0 %v2350_v38 }
  0x31   :  { %2123 = vmatpush3.bf16.msra.mxu1 %v2379_v47  ;;  %v2896_v47 = vsub.s32 2, %v69_v15  ;;  %v2455_v15 = vld [vmem:[%s3270_s5 + $0xac] ss:$12 sps:$4 sm:$0xff]  }
  0x32   :  { %2124 = vmatprep.subr.bf16.mxu1 %v2383_v48  ;;  %v2416_v48 = vld [vmem:[%s3268_s3 + $0x1e0] ss:$12 sps:$4 sm:$0xff]  }
  0x33   :  { %804 = vmatpush1.bf16.msra.mxu0 %v2348_v41  ;;  %v2408_v41 = vld [vmem:[%s3268_s3 + $0x1b0] ss:$12 sps:$4 sm:$0xff]  }
  0x34   :  { %805 = vmatprep.subr.bf16.mxu0 %v2353_v42  ;;  %v2411_v42 = vld [vmem:[%s3268_s3 + $0x1b8] ss:$12 sps:$4 sm:$0xff]  }
  0x35   :  { %2125 = vmatpush3.bf16.msra.mxu1 %v2384_v51  ;;  %v79_v51 = vrot.slane %v2846_v17, %v2896_v47  ;;  %v2453_v17 = vld [vmem:[%s3270_s5 + $0xa8] ss:$12 sps:$4 sm:$0xff]  }
  0x36   :  { %2126 = vmatprep.subr.bf16.mxu1 %v2388_v52  ;;  %v2420_v52 = vld [vmem:[%s3268_s3 + $0x1f8] ss:$12 sps:$4 sm:$0xff]  }
  0x37   :  { %806 = vmatpush1.bf16.msra.mxu0 %v2351_v43  ;;  %v2414_v43 = vld [vmem:[%s3268_s3 + $0x1cc] ss:$12 sps:$4 sm:$0xff]  }
  0x38   :  { %807 = vmatprep.subr.bf16.mxu0 %v2356_v46  ;;  %v2418_v46 = vld [vmem:[%s3268_s3 + $0x1e4] ss:$12 sps:$4 sm:$0xff]  }
  0x39   :  { %2127 = vmatpush3.bf16.msra.mxu1 %v2389_v55 }
  0x3a   :  { %2128 = vmatprep.subr.bf16.mxu1 %v2393_v6  ;;  %v2438_v6 = vld [vmem:[%s3270_s5 + $0x30] ss:$12 sps:$4 sm:$0xff]  }
  0x3b   :  { %808 = vmatpush1.bf16.msra.mxu0 %v2354_v49  ;;  %v2419_v49 = vld [vmem:[%s3268_s3 + $0x1e8] ss:$12 sps:$4 sm:$0xff]  }
  0x3c   :  { %809 = vmatprep.subr.bf16.mxu0 %v2359_v50  ;;  %v2422_v50 = vld [vmem:[%s3268_s3 + $0x1fc] ss:$12 sps:$4 sm:$0xff]  }
  0x3d   :  { %2129 = vmatpush3.bf16.msra.mxu1 %v2394_v8  ;;  %v2441_v8 = vld [vmem:[%s3270_s5 + $0x48] ss:$12 sps:$4 sm:$0xff]  }
  0x3e   :  { %2130 = vmatprep.subr.bf16.mxu1 %v2398_v10  ;;  %v2444_v10 = vld [vmem:[%s3270_s5 + $0x60] ss:$12 sps:$4 sm:$0xff]  }
  0x3f   :  { %810 = vmatpush1.bf16.msra.mxu0 %v2357_v53  ;;  %v2423_v53 = vld [vmem:[%s3268_s3 + $0x200] ss:$12 sps:$4 sm:$0xff]  }
  0x40   :  { %811 = vmatprep.subr.bf16.mxu0 %v2362_v54  ;;  %v2426_v54 = vld [vmem:[%s3268_s3 + $0x214] ss:$12 sps:$4 sm:$0xff]  }
  0x41   :  { %2131 = vmatpush3.bf16.msra.mxu1 %v2399_v12  ;;  %v2447_v12 = vld [vmem:[%s3270_s5 + $0x78] ss:$12 sps:$4 sm:$0xff]  }
  0x42   :  { %2229 = vmatprep.subr.bf16.mxu1 %v2554_v1 }
  0x43   :  { %812 = vmatpush1.bf16.msra.mxu0 %v2360_v56  ;;  %v2424_v56 = vld [vmem:[%s3268_s3 + $0x210] ss:$12 sps:$4 sm:$0xff]  }
  0x44   :  { %813 = vmatprep.subr.bf16.mxu0 %v2367_v57  ;;  %v2427_v57 = vld [vmem:[%s3268_s3 + $0x218] ss:$12 sps:$4 sm:$0xff]  }
  0x47   :  { %814 = vmatpush1.bf16.msra.mxu0 %v2365_v58  ;;  %v2430_v58 = vld [vmem:[%s3268_s3 + $0x22c] ss:$12 sps:$4 sm:$0xff]  }
  0x48   :  { %815 = vmatprep.subr.bf16.mxu0 %v2372_v59 }
  0x4b   :  { %816 = vmatpush1.bf16.msra.mxu0 %v2370_v60  ;;  %v2428_v60 = vld [vmem:[%s3268_s3 + $0x228] ss:$12 sps:$4 sm:$0xff]  }
  0x4c   :  { %817 = vmatprep.subr.bf16.mxu0 %v2377_v61  ;;  %v2431_v61 = vld [vmem:[%s3268_s3 + $0x230] ss:$12 sps:$4 sm:$0xff]  }
  0x4f   :  { %818 = vmatpush1.bf16.msra.mxu0 %v2375_v62  ;;  %v2434_v62 = vld [vmem:[%s3270_s5 + $0x4] ss:$12 sps:$4 sm:$0xff]  }
  0x50   :  { %819 = vmatprep.subr.bf16.mxu0 %v2382_v63 }
  0x53   :  { %820 = vmatpush1.bf16.msra.mxu0 %v2380_v0  ;;  %v2432_v0 = vld [vmem:[%s3270_s5] ss:$12 sps:$4 sm:$0xff]  }
  0x54   :  { %821 = vmatprep.subr.bf16.mxu0 %v2387_v3  ;;  %v2437_v3 = vld [vmem:[%s3270_s5 + $0x1c] ss:$12 sps:$4 sm:$0xff]  }
  0x57   :  { %822 = vmatpush1.bf16.msra.mxu0 %v2385_v4  ;;  %v2435_v4 = vld [vmem:[%s3270_s5 + $0x18] ss:$12 sps:$4 sm:$0xff]  }
  0x58   :  { %823 = vmatprep.subr.bf16.mxu0 %v2392_v5  ;;  %v2440_v5 = vld [vmem:[%s3270_s5 + $0x34] ss:$12 sps:$4 sm:$0xff]  }
  0x5b   :  { %824 = vmatpush1.bf16.msra.mxu0 %v2390_v7  ;;  %v2443_v7 = vld [vmem:[%s3270_s5 + $0x4c] ss:$12 sps:$4 sm:$0xff]  }
  0x5c   :  { %825 = vmatprep.subr.bf16.mxu0 %v2397_v9  ;;  %v2446_v9 = vld [vmem:[%s3270_s5 + $0x64] ss:$12 sps:$4 sm:$0xff]  }
  0x5f   :  { %826 = vmatpush1.bf16.msra.mxu0 %v2395_v11  ;;  %v2449_v11 = vld [vmem:[%s3270_s5 + $0x7c] ss:$12 sps:$4 sm:$0xff]  }
  0x60   :  { %836 = vmatprep.subr.bf16.mxu0 %v2402_v13  ;;  %v2452_v13 = vld [vmem:[%s3270_s5 + $0x94] ss:$12 sps:$4 sm:$0xff]  }
  0xf5   :  { %v245_v21 = vpop.f32.mrb[0].mxu0 }
  0xf6   :  { %v246_v22 = vadd.f32 %v245_v21, %v71_v19  ;;  %v247_v23 = vpop.f32.mrb[1].mxu0  ;;  %v2458_v19 = vld [vmem:[%s3270_s5 + $0xc4] ss:$12 sps:$4 sm:$0xff]   ;;  %v2460_v21 = vld [vmem:[%s3270_s5 + $0x8] ss:$12 sps:$4 sm:$0xff]  }
  0xf7   :  { %v248_v24 = vadd.f32 %v247_v23, %v75_v20  ;;  %v249_v25 = vpop.f32.mrb[2].mxu0  ;;  %v286_v36 = vpop.f32.mrb[0].mxu1  ;;  %v2459_v20 = vld [vmem:[%s3270_s5 + $0xc8] ss:$12 sps:$4 sm:$0xff]   ;;  %v2464_v23 = vld [vmem:[%s3270_s5 + $0xe0] ss:$12 sps:$4 sm:$0xff]  }
  0xf8   :  { %v292_v26 = vmax.f32 %v246_v22, 0.0  ;;  %v250_v27 = vpop.f32.mrb[3].mxu0  ;;  %v2227_v38 = vpop.f32.mrb[1].mxu1  ;;  %v287_v55 = vadd.f32 %v286_v36, %v79_v51  ;;  %v2456_v22 = vld [vmem:[%s3270_s5 + $0xc0] ss:$12 sps:$4 sm:$0xff]  }
  0xf9   :  { %v293_v28 = vmax.f32 %v248_v24, 0.0  ;;  %v289_v39 = vpop.f32.mrb[2].mxu1  ;;  %v2463_v24 = vld [vmem:[%s3270_s5 + $0xdc] ss:$12 sps:$4 sm:$0xff]   ;;  %v2465_v25 = vld [vmem:[%s3270_s5 + $0x20] ss:$12 sps:$4 sm:$0xff]  }
  0xfa   :  { %v295_v32 = vpack.c.bf16 %v292_v26, %v292_v26  ;;  %v2228_v40 = vpop.f32.mrb[3].mxu1  ;;  %v294_v59 = vmax.f32 %v287_v55, 0.0  ;;  %v2469_v26 = vld [vmem:[%s3270_s5 + $0xf8] ss:$12 sps:$4 sm:$0xff]   ;;  %v2484_v38 = vld [vmem:[%s3270_s5 + $0x140] ss:$12 sps:$4 sm:$0xff]  }
  0xfb   :  { %v296_v29 = vpack.c.bf16 %v293_v28, %v293_v28  ;;  %v2461_v27 = vld [vmem:[%s3270_s5 + $0xd8] ss:$12 sps:$4 sm:$0xff]   ;;  %v2468_v28 = vld [vmem:[%s3270_s5 + $0xf4] ss:$12 sps:$4 sm:$0xff]   ;;  %v2483_v40 = vld [vmem:[%s3270_s5 + $0x13c] ss:$12 sps:$4 sm:$0xff]  }
  0xfc   :  { %v297_v63 = vpack.c.bf16 %v294_v59, %v294_v59  ;;  %v2478_v36 = vld [vmem:[%s3270_s5 + $0x124] ss:$12 sps:$4 sm:$0xff]   ;;  %v2476_v39 = vld [vmem:[%s3270_s5 + $0x120] ss:$12 sps:$4 sm:$0xff]  }
  0xfd   :  { %827 = vmatprep.mubr.bf16.mxu0 %v296_v29  ;;  %909 = vmatprep.mubr.bf16.mxu1 %v296_v29  ;;  %v2470_v29 = vld [vmem:[%s3270_s5 + $0x38] ss:$12 sps:$4 sm:$0xff]   ;;  %v2495_v51 = vld [vmem:[%s3270_s5 + $0xb0] ss:$12 sps:$4 sm:$0xff]  }
  0xfe   :  { %828 = vmatmul.mubr.bf16.vlgmr.msra.gmra.mrb[4].mxu0 %v295_v32  ;;  %910 = vmatmul.mubr.bf16.vlgmr.msra.gmra.mrb[4].mxu1 %v295_v32  ;;  %v2473_v32 = vld [vmem:[%s3270_s5 + $0x10c] ss:$12 sps:$4 sm:$0xff]  }
  0xff   :  { %837 = vmatpush1.bf16.msra.mxu0 %v2400_v30  ;;  %2230 = vmatpush3.bf16.msra.mxu1 %v2403_v31  ;;  %v2474_v30 = vld [vmem:[%s3270_s5 + $0x110] ss:$12 sps:$4 sm:$0xff]  }
 0x100   :  { %838 = vmatprep.subr.bf16.mxu0 %v2406_v33  ;;  %2231 = vmatprep.subr.bf16.mxu1 %v2554_v1  ;;  %v2466_v31 = vld [vmem:[%s3270_s5 + $0xf0] ss:$12 sps:$4 sm:$0xff]  }
 0x101   :  { %868 = vmatprep.mubr.bf16.mxu0 %v2555_v2  ;;  %2245 = vmatprep.mubr.msk.bf16.mxu1 %vm2556_vm0, %v2554_v1  ;;  %v2475_v33 = vld [vmem:[%s3270_s5 + $0x50] ss:$12 sps:$4 sm:$0xff]  }
 0x103   :  { %839 = vmatpush1.bf16.msra.mxu0 %v2404_v34  ;;  %2232 = vmatpush3.bf16.msra.mxu1 %v2407_v35  ;;  %v2479_v34 = vld [vmem:[%s3270_s5 + $0x128] ss:$12 sps:$4 sm:$0xff]  }
 0x104   :  { %840 = vmatprep.subr.bf16.mxu0 %v2410_v37  ;;  %2233 = vmatprep.subr.bf16.mxu1 %v2554_v1  ;;  %v2471_v35 = vld [vmem:[%s3270_s5 + $0x108] ss:$12 sps:$4 sm:$0xff]  }
 0x105   :  { %v2480_v37 = vld [vmem:[%s3270_s5 + $0x68] ss:$12 sps:$4 sm:$0xff]  }
 0x107   :  { %841 = vmatpush1.bf16.msra.mxu0 %v2408_v41  ;;  %2234 = vmatpush3.bf16.msra.mxu1 %v2411_v42  ;;  %v2485_v41 = vld [vmem:[%s3270_s5 + $0x80] ss:$12 sps:$4 sm:$0xff]   ;;  %v2481_v42 = vld [vmem:[%s3270_s5 + $0x138] ss:$12 sps:$4 sm:$0xff]  }
 0x108   :  { %842 = vmatprep.subr.bf16.mxu0 %v2414_v43  ;;  %2235 = vmatprep.subr.bf16.mxu1 %v2554_v1  ;;  %v2488_v43 = vld [vmem:[%s3270_s5 + $0x154] ss:$12 sps:$4 sm:$0xff]  }
 0x10b   :  { %843 = vmatpush1.bf16.msra.mxu0 %v2412_v44  ;;  %2236 = vmatpush3.bf16.msra.mxu1 %v2415_v45  ;;  %v2489_v44 = vld [vmem:[%s3270_s5 + $0x158] ss:$12 sps:$4 sm:$0xff]   ;;  %v2486_v45 = vld [vmem:[%s3270_s5 + $0x150] ss:$12 sps:$4 sm:$0xff]  }
 0x10c   :  { %844 = vmatprep.subr.bf16.mxu0 %v2418_v46  ;;  %2237 = vmatprep.subr.bf16.mxu1 %v2554_v1  ;;  %v2490_v46 = vld [vmem:[%s3270_s5 + $0x98] ss:$12 sps:$4 sm:$0xff]  }
 0x10f   :  { %845 = vmatpush1.bf16.msra.mxu0 %v2416_v48  ;;  %2238 = vmatpush3.bf16.msra.mxu1 %v2419_v49  ;;  %v2493_v48 = vld [vmem:[%s3270_s5 + $0x16c] ss:$12 sps:$4 sm:$0xff]   ;;  %v2494_v49 = vld [vmem:[%s3270_s5 + $0x170] ss:$12 sps:$4 sm:$0xff]  }
 0x110   :  { %846 = vmatprep.subr.bf16.mxu0 %v2422_v50  ;;  %2239 = vmatprep.subr.bf16.mxu1 %v2554_v1  ;;  %v2491_v50 = vld [vmem:[%s3270_s5 + $0x168] ss:$12 sps:$4 sm:$0xff]  }
 0x113   :  { %847 = vmatpush1.bf16.msra.mxu0 %v2420_v52  ;;  %2240 = vmatpush3.bf16.msra.mxu1 %v2423_v53  ;;  %v2498_v52 = vld [vmem:[%s3270_s5 + $0x184] ss:$12 sps:$4 sm:$0xff]  }
 0x114   :  { %848 = vmatprep.subr.bf16.mxu0 %v2426_v54  ;;  %2241 = vmatprep.subr.bf16.mxu1 %v2554_v1 }
 0x117   :  { %849 = vmatpush1.bf16.msra.mxu0 %v2424_v56  ;;  %2242 = vmatpush3.bf16.msra.mxu1 %v2427_v57 }
 0x118   :  { %850 = vmatprep.subr.bf16.mxu0 %v2430_v58  ;;  %2243 = vmatprep.subr.bf16.mxu1 %v2554_v1  ;;  %v394_v58 = vld [vmem:[%s3272_s4] sm:$0x7] }
 0x119   :  { %v407_v59 = vrot.slane %v394_v58, %v2896_v47 }
 0x11b   :  { %851 = vmatpush1.bf16.msra.mxu0 %v2428_v60  ;;  %2244 = vmatpush3.bf16.msra.mxu1 %v2431_v61  ;;  %v399_v60 = vrot.slane %v394_v58, %v2841_v16  ;;  %v403_v61 = vrot.slane %v394_v58, %v2848_v18  ;;  %v2543_v58 = vld [vmem:[%s3273_s7 + $0xa8] sm:$0xff]  }
 0x11c   :  { %1460 = vmatprep.subr.bf16.mxu1 %v2434_v62  ;;  %2147 = vmatprep.subr.bf16.mxu0 %v2459_v20  ;;  %v2502_v20 = vld [vmem:[%s3270_s5 + $0x19c] ss:$12 sps:$4 sm:$0xff]  }
 0x11e   :  { %869 = vmatmul.mubr.bf16.vlgmr.msra.gmra.mrb[4].mxu0 %v297_v63  ;;  %2246 = vmatmul.mubr.bf16.vlgmr.msra.gmra.mrb[8].mxu1 %v297_v63 }
 0x11f   :  { %1461 = vmatpush1.bf16.msra.mxu1 %v2432_v0  ;;  %2148 = vmatpush3.bf16.msra.mxu0 %v2460_v21  ;;  %v2500_v21 = vld [vmem:[%s3270_s5 + $0x198] ss:$12 sps:$4 sm:$0xff]  }
 0x120   :  { %1462 = vmatprep.subr.bf16.mxu1 %v2437_v3  ;;  %2149 = vmatprep.subr.bf16.mxu0 %v2464_v23  ;;  %v2506_v23 = vld [vmem:[%s3270_s5 + $0x1b4] ss:$12 sps:$4 sm:$0xff]  }
 0x123   :  { %1463 = vmatpush1.bf16.msra.mxu1 %v2435_v4  ;;  %2150 = vmatpush3.bf16.msra.mxu0 %v2465_v25  ;;  %v2507_v25 = vld [vmem:[%s3270_s5 + $0x1b8] ss:$12 sps:$4 sm:$0xff]  }
 0x124   :  { %1464 = vmatprep.subr.bf16.mxu1 %v2440_v5  ;;  %2151 = vmatprep.subr.bf16.mxu0 %v2469_v26  ;;  %v2508_v26 = vld [vmem:[%s3270_s5 + $0x1c8] ss:$12 sps:$4 sm:$0xff]  }
 0x127   :  { %1465 = vmatpush1.bf16.msra.mxu1 %v2438_v6  ;;  %2152 = vmatpush3.bf16.msra.mxu0 %v2470_v29  ;;  %v2512_v29 = vld [vmem:[%s3270_s5 + $0x1e0] ss:$12 sps:$4 sm:$0xff]  }
 0x128   :  { %1466 = vmatprep.subr.bf16.mxu1 %v2443_v7  ;;  %2153 = vmatprep.subr.bf16.mxu0 %v2474_v30  ;;  %v2515_v30 = vld [vmem:[%s3270_s5 + $0x1e8] ss:$12 sps:$4 sm:$0xff]  }
 0x12b   :  { %1467 = vmatpush1.bf16.msra.mxu1 %v2441_v8  ;;  %2154 = vmatpush3.bf16.msra.mxu0 %v2475_v33  ;;  %v2519_v33 = vld [vmem:[%s3270_s5 + $0x200] ss:$12 sps:$4 sm:$0xff]  }
 0x12c   :  { %1468 = vmatprep.subr.bf16.mxu1 %v2446_v9  ;;  %2155 = vmatprep.subr.bf16.mxu0 %v2479_v34  ;;  %v2522_v34 = vld [vmem:[%s3270_s5 + $0x214] ss:$12 sps:$4 sm:$0xff]  }
 0x12f   :  { %1469 = vmatpush1.bf16.msra.mxu1 %v2444_v10  ;;  %2156 = vmatpush3.bf16.msra.mxu0 %v2480_v37  ;;  %v2526_v37 = vld [vmem:[%s3270_s5 + $0x22c] ss:$12 sps:$4 sm:$0xff]  }
 0x130   :  { %1470 = vmatprep.subr.bf16.mxu1 %v2449_v11  ;;  %2157 = vmatprep.subr.bf16.mxu0 %v2484_v38  ;;  %v2524_v38 = vld [vmem:[%s3270_s5 + $0x228] ss:$12 sps:$4 sm:$0xff]  }
 0x133   :  { %1471 = vmatpush1.bf16.msra.mxu1 %v2447_v12  ;;  %2158 = vmatpush3.bf16.msra.mxu0 %v2485_v41 }
 0x134   :  { %1472 = vmatprep.subr.bf16.mxu1 %v2452_v13  ;;  %2159 = vmatprep.subr.bf16.mxu0 %v2489_v44  ;;  %v2530_v44 = vld [vmem:[%s3273_s7] sm:$0xff]  }
 0x137   :  { %1473 = vmatpush1.bf16.msra.mxu1 %v2450_v14  ;;  %2160 = vmatpush3.bf16.msra.mxu0 %v2490_v46  ;;  %v2532_v46 = vld [vmem:[%s3273_s7 + $0x48] sm:$0xff]  }
 0x138   :  { %1474 = vmatprep.subr.bf16.mxu1 %v2455_v15  ;;  %2161 = vmatprep.subr.bf16.mxu0 %v2494_v49  ;;  %v2496_v15 = vld [vmem:[%s3270_s5 + $0x180] ss:$12 sps:$4 sm:$0xff]   ;;  %v2534_v49 = vld [vmem:[%s3273_s7 + $0x90] sm:$0xff]  }
 0x13b   :  { %1475 = vmatpush1.bf16.msra.mxu1 %v2453_v17  ;;  %2162 = vmatpush3.bf16.msra.mxu0 %v2495_v51  ;;  %v2499_v17 = vld [vmem:[%s3270_s5 + $0x188] ss:$12 sps:$4 sm:$0xff]  }
 0x13c   :  { %1476 = vmatprep.subr.bf16.mxu1 %v2458_v19  ;;  %2249 = vmatprep.subr.bf16.mxu0 %v2554_v1  ;;  %v2536_v51 = vld [vmem:[%s3273_s7 + $0x10] sm:$0xff]  }
 0x13f   :  { %1477 = vmatpush1.bf16.msra.mxu1 %v2456_v22  ;;  %v2503_v22 = vld [vmem:[%s3270_s5 + $0x1a0] ss:$12 sps:$4 sm:$0xff]  }
 0x140   :  { %1478 = vmatprep.subr.bf16.mxu1 %v2463_v24  ;;  %v2504_v24 = vld [vmem:[%s3270_s5 + $0x1b0] ss:$12 sps:$4 sm:$0xff]  }
 0x143   :  { %1479 = vmatpush1.bf16.msra.mxu1 %v2461_v27  ;;  %v2511_v27 = vld [vmem:[%s3270_s5 + $0x1d0] ss:$12 sps:$4 sm:$0xff]  }
 0x144   :  { %1480 = vmatprep.subr.bf16.mxu1 %v2468_v28  ;;  %v2514_v28 = vld [vmem:[%s3270_s5 + $0x1e4] ss:$12 sps:$4 sm:$0xff]  }
 0x147   :  { %1481 = vmatpush1.bf16.msra.mxu1 %v2466_v31  ;;  %v2518_v31 = vld [vmem:[%s3270_s5 + $0x1fc] ss:$12 sps:$4 sm:$0xff]  }
 0x148   :  { %1482 = vmatprep.subr.bf16.mxu1 %v2473_v32  ;;  %v2516_v32 = vld [vmem:[%s3270_s5 + $0x1f8] ss:$12 sps:$4 sm:$0xff]  }
 0x14b   :  { %1483 = vmatpush1.bf16.msra.mxu1 %v2471_v35  ;;  %v2520_v35 = vld [vmem:[%s3270_s5 + $0x210] ss:$12 sps:$4 sm:$0xff]  }
 0x14c   :  { %1484 = vmatprep.subr.bf16.mxu1 %v2478_v36  ;;  %v2523_v36 = vld [vmem:[%s3270_s5 + $0x218] ss:$12 sps:$4 sm:$0xff]  }
 0x14f   :  { %1485 = vmatpush1.bf16.msra.mxu1 %v2476_v39  ;;  %v2527_v39 = vld [vmem:[%s3270_s5 + $0x230] ss:$12 sps:$4 sm:$0xff]  }
 0x150   :  { %1486 = vmatprep.subr.bf16.mxu1 %v2483_v40 }
 0x153   :  { %1487 = vmatpush1.bf16.msra.mxu1 %v2481_v42  ;;  %v2528_v42 = vld [vmem:[%s3273_s7 + $0x80] sm:$0xff]  }
 0x154   :  { %1488 = vmatprep.subr.bf16.mxu1 %v2488_v43  ;;  %v2529_v43 = vld [vmem:[%s3273_s7 + $0x40] sm:$0xff]  }
 0x157   :  { %1489 = vmatpush1.bf16.msra.mxu1 %v2486_v45  ;;  %v2531_v45 = vld [vmem:[%s3273_s7 + $0x88] sm:$0xff]  }
 0x158   :  { %1490 = vmatprep.subr.bf16.mxu1 %v2493_v48  ;;  %v2533_v48 = vld [vmem:[%s3273_s7 + $0x8] sm:$0xff]  }
 0x15b   :  { %1491 = vmatpush1.bf16.msra.mxu1 %v2491_v50  ;;  %v2535_v50 = vld [vmem:[%s3273_s7 + $0x50] sm:$0xff]  }
 0x15c   :  { %1501 = vmatprep.subr.bf16.mxu1 %v2498_v52  ;;  %v2537_v52 = vld [vmem:[%s3273_s7 + $0x98] sm:$0xff]  }
 0x1d1   :  { %v2132_v53 = vpop.f32.mrb[4].mxu1 }
 0x1d2   :  { %v2133_v54 = vpop.f32.mrb[5].mxu1 }
 0x1d3   :  { %v2134_v55 = vadd.f32 %v2133_v54, %v2132_v53  ;;  %v2135_v56 = vpop.f32.mrb[6].mxu1  ;;  %v2538_v53 = vld [vmem:[%s3273_s7 + $0x58] sm:$0xff]  }
 0x1d4   :  { %v2136_v57 = vpop.f32.mrb[7].mxu1  ;;  %v2539_v54 = vld [vmem:[%s3273_s7 + $0x18] sm:$0xff]   ;;  %v2540_v56 = vld [vmem:[%s3273_s7 + $0xa0] sm:$0xff]  }
 0x1d5   :  { %v912_v62 = vadd.f32 %v2134_v55, %v407_v59  ;;  %v2541_v55 = vld [vmem:[%s3273_s7 + $0x60] sm:$0xff]   ;;  %v2544_v59 = vld [vmem:[%s3273_s7 + $0x68] sm:$0xff]  }
 0x1d6   :  { %v2542_v57 = vld [vmem:[%s3273_s7 + $0x20] sm:$0xff]  }
 0x1f1   :  { %v870_v63 = vpop.f32.mrb[4].mxu0  ;;  %v951_v0 = vpop.f32.mrb[8].mxu1 }
 0x1f2   :  { %v2289_v3 = vadd.f32 %v870_v63, %v399_v60  ;;  %v3091_v4 = vadd.f32 %v951_v0, %v912_v62  ;;  %v872_v5 = vpop.f32.mrb[5].mxu0  ;;  %v2247_v6 = vpop.f32.mrb[9].mxu1  ;;  %v2545_v60 = vld [vmem:[%s3273_s7 + $0x28] sm:$0xff]   ;;  %v2547_v62 = vld [vmem:[%s3273_s7 + $0x70] sm:$0xff]   ;;  %v2549_v0 = vld [vmem:[%s3273_s7 + $0xb8] sm:$0xff]  }
 0x1f3   :  { %v2290_v7 = vadd.f32 %v872_v5, %v403_v61  ;;  %v874_v8 = vpop.f32.mrb[6].mxu0  ;;  %v954_v9 = vpop.f32.mrb[10].mxu1  ;;  %v2546_v61 = vld [vmem:[%s3273_s7 + $0xb0] sm:$0xff]  }
 0x1f4   :  { %v957_v10 = vmax.f32 %v2289_v3, 0.0  ;;  %v875_v11 = vpop.f32.mrb[7].mxu0  ;;  %v2248_v12 = vpop.f32.mrb[11].mxu1  ;;  %v959_v40 = vmax.f32 %v3091_v4, 0.0  ;;  %v2548_v63 = vld [vmem:[%s3273_s7 + $0x30] sm:$0xff]   ;;  %v2550_v3 = vld [vmem:[%s3273_s7 + $0x78] sm:$0xff]  }
 0x1f5   :  { %v958_v13 = vmax.f32 %v2290_v7, 0.0  ;;  %v2551_v4 = vld [vmem:[%s3273_s7 + $0x38] sm:$0xff]   ;;  %v1059_v9 = vld [vmem:[%s3274_s6] sm:$0x7] }
 0x1f6   :  { %v960_v19 = vpack.c.bf16 %v957_v10, %v957_v10  ;;  %v962_v41 = vpack.c.bf16 %v959_v40, %v959_v40  ;;  %v1072_v10 = vrot.slane %v1059_v9, %v2896_v47  ;;  %v1064_v11 = vrot.slane %v1059_v9, %v2841_v16 }
 0x1f7   :  { %v961_v14 = vpack.c.bf16 %v958_v13, %v958_v13  ;;  %v1068_v12 = vrot.slane %v1059_v9, %v2848_v18 }
 0x1f9   :  { %1492 = vmatprep.mubr.bf16.mxu1 %v961_v14  ;;  %1574 = vmatprep.mubr.bf16.mxu0 %v961_v14 }
 0x1fa   :  { %1493 = vmatmul.mubr.bf16.vlgmr.msra.gmra.mrb[12].mxu1 %v960_v19  ;;  %1575 = vmatmul.mubr.bf16.vlgmr.msra.gmra.mrb[8].mxu0 %v960_v19 }
 0x1fb   :  { %1502 = vmatpush1.bf16.msra.mxu1 %v2496_v15  ;;  %2250 = vmatpush3.bf16.msra.mxu0 %v2499_v17 }
 0x1fc   :  { %1503 = vmatprep.subr.bf16.mxu1 %v2502_v20  ;;  %2251 = vmatprep.subr.bf16.mxu0 %v2554_v1 }
 0x1fd   :  { %1533 = vmatprep.mubr.bf16.mxu1 %v2555_v2  ;;  %2265 = vmatprep.mubr.msk.bf16.mxu0 %vm2556_vm0, %v2554_v1  ;;  %v2510_v2 = vld [vmem:[%s3270_s5 + $0x1cc] ss:$12 sps:$4 sm:$0xff]  }
 0x1ff   :  { %1504 = vmatpush1.bf16.msra.mxu1 %v2500_v21  ;;  %2252 = vmatpush3.bf16.msra.mxu0 %v2503_v22 }
 0x200   :  { %1505 = vmatprep.subr.bf16.mxu1 %v2506_v23  ;;  %2253 = vmatprep.subr.bf16.mxu0 %v2554_v1 }
 0x203   :  { %1506 = vmatpush1.bf16.msra.mxu1 %v2504_v24  ;;  %2254 = vmatpush3.bf16.msra.mxu0 %v2507_v25 }
 0x204   :  { %1507 = vmatprep.subr.bf16.mxu1 %v2510_v2  ;;  %2255 = vmatprep.subr.bf16.mxu0 %v2554_v1 }
 0x207   :  { %1508 = vmatpush1.bf16.msra.mxu1 %v2508_v26  ;;  %2256 = vmatpush3.bf16.msra.mxu0 %v2511_v27 }
 0x208   :  { %1509 = vmatprep.subr.bf16.mxu1 %v2514_v28  ;;  %2257 = vmatprep.subr.bf16.mxu0 %v2554_v1 }
 0x20b   :  { %1510 = vmatpush1.bf16.msra.mxu1 %v2512_v29  ;;  %2258 = vmatpush3.bf16.msra.mxu0 %v2515_v30 }
 0x20c   :  { %1511 = vmatprep.subr.bf16.mxu1 %v2518_v31  ;;  %2259 = vmatprep.subr.bf16.mxu0 %v2554_v1 }
 0x20f   :  { %1512 = vmatpush1.bf16.msra.mxu1 %v2516_v32  ;;  %2260 = vmatpush3.bf16.msra.mxu0 %v2519_v33  ;;  %v2082_v33 = vld [vmem:[%s3275_s8] ss:$0 sm:$0xff] }
 0x210   :  { %1513 = vmatprep.subr.bf16.mxu1 %v2522_v34  ;;  %2261 = vmatprep.subr.bf16.mxu0 %v2554_v1 }
 0x213   :  { %1514 = vmatpush1.bf16.msra.mxu1 %v2520_v35  ;;  %2262 = vmatpush3.bf16.msra.mxu0 %v2523_v36 }
 0x214   :  { %1515 = vmatprep.subr.bf16.mxu1 %v2526_v37  ;;  %2263 = vmatprep.subr.bf16.mxu0 %v2554_v1 }
 0x217   :  { %1516 = vmatpush1.bf16.msra.mxu1 %v2524_v38  ;;  %2264 = vmatpush3.bf16.msra.mxu0 %v2527_v39 }
 0x218   :  { %2269 = vmatprep.subr.bf16.mxu1 %v2554_v1  ;;  %2178 = vmatprep.subr.bf16.mxu0 %v2529_v43 }
 0x21a   :  { %1534 = vmatmul.mubr.bf16.vlgmr.msra.gmra.mrb[12].mxu1 %v962_v41  ;;  %2266 = vmatmul.mubr.bf16.vlgmr.msra.gmra.mrb[12].mxu0 %v962_v41 }
 0x21b   :  { %2285 = vmatprep.mubr.msk.bf16.mxu1 %vm2556_vm0, %v2554_v1  ;;  %2270 = vmatpush3.bf16.msra.mxu1 %v2528_v42 }
 0x21c   :  { %2271 = vmatprep.subr.bf16.mxu1 %v2554_v1  ;;  %2179 = vmatpush3.bf16.msra.mxu0 %v2530_v44 }
 0x21d   :  { %2180 = vmatprep.subr.bf16.mxu0 %v2532_v46 }
 0x21f   :  { %2272 = vmatpush3.bf16.msra.mxu1 %v2531_v45 }
 0x220   :  { %2273 = vmatprep.subr.bf16.mxu1 %v2554_v1  ;;  %2181 = vmatpush3.bf16.msra.mxu0 %v2533_v48 }
 0x221   :  { %2182 = vmatprep.subr.bf16.mxu0 %v2535_v50 }
 0x223   :  { %2274 = vmatpush3.bf16.msra.mxu1 %v2534_v49 }
 0x224   :  { %2275 = vmatprep.subr.bf16.mxu1 %v2554_v1  ;;  %2183 = vmatpush3.bf16.msra.mxu0 %v2536_v51 }
 0x225   :  { %2184 = vmatprep.subr.bf16.mxu0 %v2538_v53 }
 0x227   :  { %2276 = vmatpush3.bf16.msra.mxu1 %v2537_v52 }
 0x228   :  { %2277 = vmatprep.subr.bf16.mxu1 %v2554_v1  ;;  %2185 = vmatpush3.bf16.msra.mxu0 %v2539_v54 }
 0x229   :  { %2186 = vmatprep.subr.bf16.mxu0 %v2541_v55 }
 0x22b   :  { %2278 = vmatpush3.bf16.msra.mxu1 %v2540_v56 }
 0x22c   :  { %2279 = vmatprep.subr.bf16.mxu1 %v2554_v1  ;;  %2187 = vmatpush3.bf16.msra.mxu0 %v2542_v57 }
 0x22d   :  { %2188 = vmatprep.subr.bf16.mxu0 %v2544_v59 }
 0x22f   :  { %2280 = vmatpush3.bf16.msra.mxu1 %v2543_v58 }
 0x230   :  { %2281 = vmatprep.subr.bf16.mxu1 %v2554_v1  ;;  %2189 = vmatpush3.bf16.msra.mxu0 %v2545_v60 }
 0x231   :  { %2190 = vmatprep.subr.bf16.mxu0 %v2547_v62 }
 0x233   :  { %2282 = vmatpush3.bf16.msra.mxu1 %v2546_v61 }
 0x234   :  { %2283 = vmatprep.subr.bf16.mxu1 %v2554_v1  ;;  %2191 = vmatpush3.bf16.msra.mxu0 %v2548_v63 }
 0x235   :  { %2192 = vmatprep.subr.bf16.mxu0 %v2550_v3 }
 0x237   :  { %2284 = vmatpush3.bf16.msra.mxu1 %v2549_v0 }
 0x238   :  { %2193 = vmatpush3.bf16.msra.mxu0 %v2551_v4 }
 0x2cd   :  { %v2163_v5 = vpop.f32.mrb[8].mxu0 }
 0x2ce   :  { %v2164_v6 = vpop.f32.mrb[9].mxu0 }
 0x2cf   :  { %v2165_v7 = vadd.f32 %v2164_v6, %v2163_v5  ;;  %v2166_v1 = vpop.f32.mrb[10].mxu0 }
 0x2d0   :  { %v2167_v8 = vpop.f32.mrb[11].mxu0 }
 0x2d1   :  { %v1577_v13 = vadd.f32 %v2165_v7, %v1072_v10 }
 0x2ed   :  { %v1535_v14 = vpop.f32.mrb[12].mxu1  ;;  %v1616_v15 = vpop.f32.mrb[12].mxu0 }
 0x2ee   :  { %v2291_v17 = vadd.f32 %v1535_v14, %v1064_v11  ;;  %v1617_v19 = vadd.f32 %v1616_v15, %v1577_v13  ;;  %v1537_v20 = vpop.f32.mrb[13].mxu1  ;;  %v2267_v21 = vpop.f32.mrb[13].mxu0 }
 0x2ef   :  { %v2292_v22 = vadd.f32 %v1537_v20, %v1068_v12  ;;  %v1539_v23 = vpop.f32.mrb[14].mxu1  ;;  %v1619_v24 = vpop.f32.mrb[14].mxu0 }
 0x2f0   :  { %v1622_v25 = vmax.f32 %v2291_v17, 0.0  ;;  %v1624_v2 = vmax.f32 %v1617_v19, 0.0  ;;  %v1540_v26 = vpop.f32.mrb[15].mxu1  ;;  %v2268_v27 = vpop.f32.mrb[15].mxu0 }
 0x2f1   :  { %v1623_v28 = vmax.f32 %v2292_v22, 0.0 }
 0x2f2   :  { %v1627_v47 = vpack.c.bf16 %v1624_v2, %v1624_v2  ;;  %v1625_v16 = vpack.c.bf16 %v1622_v25, %v1622_v25 }
 0x2f3   :  { %v1626_v29 = vpack.c.bf16 %v1623_v28, %v1623_v28 }
 0x2f4   :  { %2286 = vmatmul.mubr.bf16.vlgmr.msra.gmra.mrb[16].mxu1 %v1627_v47 }
 0x2f5   :  { %1859 = vmatprep.mubr.bf16.mxu0 %v1626_v29 }
 0x2f6   :  { %1860 = vmatmul.mubr.bf16.vlgmr.msra.gmra.mrb[16].mxu0 %v1625_v16 }
 0x3c7   :  { %v1901_v18 = vpop.f32.mrb[16].mxu1 }
 0x3c8   :  { %v2287_v30 = vpop.f32.mrb[17].mxu1 }
 0x3c9   :  { %v2194_v31 = vpop.f32.mrb[16].mxu0  ;;  %v1904_v32 = vpop.f32.mrb[18].mxu1 }
 0x3ca   :  { %v2195_v34 = vpop.f32.mrb[17].mxu0  ;;  %v2288_v35 = vpop.f32.mrb[19].mxu1 }
 0x3cb   :  { %v2196_v36 = vadd.f32 %v2195_v34, %v2194_v31  ;;  %v2197_v37 = vpop.f32.mrb[18].mxu0 }
 0x3cc   :  { %v2198_v38 = vpop.f32.mrb[19].mxu0 }
 0x3cd   :  { %v1862_v39 = vadd.f32 %v2196_v36, %v2082_v33 }
 0x3cf   :  { %v1902_v40 = vadd.f32 %v1901_v18, %v1862_v39 }
 0x3d1   :  { %2552 = vtanh.f32 %v1902_v40 }
 0x3db   :  { %v2553_v41 = vpop.eup %2552 }
 0x3dc   :  { %v1908_v42 = vmul.f32 2.0, %v2553_v41 }
 0x3de   :  { %1909 = vst [vmem:[%s3276_s9] sm:$0xff] %v1908_v42 }

</bundles_post_ra>
